<compile_context>
chip_gen: v7x
topology: tpu7x:2x2x1
jax: 0.10.0
libtpu: 0.0.40
codegen_flags: <defaults>
</compile_context>

<pallas_src>
import jax
import jax.numpy as jnp
from jax.experimental import pallas as pl
from jax.experimental.pallas import tpu as pltpu


def _round_up(x, m):
    return ((x + m - 1) // m) * m


def _choose_tiles(dim, max_tile, align, allow_full_single=False):
    """Pick (tile_eff, dim_padded, n_tiles) with bounded padding waste."""
    if dim <= max_tile:
        if allow_full_single:
            return dim, dim, 1          # full-dim block (no padding needed)
        t = _round_up(dim, align)
        return t, t, 1
    n = -(-dim // max_tile)             # ceil
    t = _round_up(-(-dim // n), align)  # ceil(dim/n) rounded to alignment
    return t, t * n, n


def _dalora_linear_kernel(x_ref, w_ref, bias_ref, xa_ref, b_ref, o_ref, acc_ref):
    """One (tm, tn) output tile of: x @ W^T + bias + (xa @ (scaling*B)^T).

    Grid = (i: row tiles, j: out-feature tiles, k: in-feature tiles).
    acc_ref is an fp32 accumulator over the k (reduction) axis.
    """
    k = pl.program_id(2)

    @pl.when(k == 0)
    def _():
        acc_ref[...] = jnp.zeros_like(acc_ref)

    # Base matmul: (tm, tk) @ (tk, tn), accumulated in fp32 on the MXU.
    acc_ref[...] += jnp.dot(x_ref[...], w_ref[...],
                            preferred_element_type=jnp.float32)

    @pl.when(k == pl.num_programs(2) - 1)
    def _():
        # Low-rank update (scaling already folded into B): (tm, r) @ (r, tn).
        lora = jnp.dot(xa_ref[...], b_ref[...],
                       preferred_element_type=jnp.float32)
        o_ref[...] = (acc_ref[...] + bias_ref[...].astype(jnp.float32)
                      + lora).astype(o_ref.dtype)


def dalora_linear(x, w_base, bias, dalora_a, dalora_b, scaling,
                  *, tm=256, tn=256, tk=1024):
    """x: [..., in]; returns [..., out] = base(x) + B(A(x)) * scaling."""
    in_features = x.shape[-1]
    out_features = w_base.shape[0]
    r = dalora_a.shape[0]
    lead_shape = x.shape[:-1]
    M = 1
    for d in lead_shape:
        M *= d

    x2d = x.reshape(M, in_features)

    # One-time (outside the hot loop) weight prep:
    #   fold scaling into B, transpose to MXU-friendly layouts.
    b_scaled_t = (dalora_b.astype(jnp.float32) * scaling).astype(dalora_b.dtype).T  # [r, out]
    w_t = w_base.T                                                                   # [in, out]

    # Hoisted rank-r projection: computed once (tiny (M, r) result) instead of
    # once per out-feature tile inside the kernel.
    # TODO(synk): Dalora_dropout is p=0.0 (identity) here; p>0 training dropout
    # is not implemented.
    xa = jnp.dot(x2d, dalora_a.T.astype(x2d.dtype),
                 preferred_element_type=jnp.float32).astype(b_scaled_t.dtype)  # [M, r]

    tm_eff, M_pad, gm = _choose_tiles(M, tm, 8)
    tn_eff, N_pad, gn = _choose_tiles(out_features, tn, 128)
    tk_eff, K_pad, gk = _choose_tiles(in_features, tk, 128, allow_full_single=True)

    if M_pad != M:
        x2d = jnp.pad(x2d, ((0, M_pad - M), (0, 0)))
        xa = jnp.pad(xa, ((0, M_pad - M), (0, 0)))
    if K_pad != in_features:
        x2d = jnp.pad(x2d, ((0, 0), (0, K_pad - in_features)))
        w_t = jnp.pad(w_t, ((0, K_pad - in_features), (0, 0)))
    if N_pad != out_features:
        pad_n = N_pad - out_features
        w_t = jnp.pad(w_t, ((0, 0), (0, pad_n)))
        bias = jnp.pad(bias, (0, pad_n))
        b_scaled_t = jnp.pad(b_scaled_t, ((0, 0), (0, pad_n)))
    bias2d = bias.reshape(1, N_pad)

    grid = (gm, gn, gk)

    # Explicit VMEM budget: double-buffered inputs/outputs + fp32 accumulator,
    # kept >= 32 MiB (above v5e/v6e scoped defaults) and capped with headroom
    # below v7x's 64 MiB physical VMEM.
    itemsize = max(jnp.dtype(x.dtype).itemsize, jnp.dtype(w_base.dtype).itemsize)
    est = (2 * (tm_eff * tk_eff + tk_eff * tn_eff + tn_eff
                + tm_eff * r + r * tn_eff + tm_eff * tn_eff) * itemsize
           + tm_eff * tn_eff * 4)
    vmem_limit = int(min(56 * 2**20, max(32 * 2**20, 2 * est)))

    out2d = pl.pallas_call(
        _dalora_linear_kernel,
        out_shape=jax.ShapeDtypeStruct((M_pad, N_pad), x.dtype),
        grid_spec=pltpu.PrefetchScalarGridSpec(
            num_scalar_prefetch=0,
            grid=grid,
            in_specs=[
                pl.BlockSpec((tm_eff, tk_eff), lambda i, j, k: (i, k)),  # x rows
                pl.BlockSpec((tk_eff, tn_eff), lambda i, j, k: (k, j)),  # W^T slab
                pl.BlockSpec((1, tn_eff), lambda i, j, k: (0, j)),       # bias slab
                pl.BlockSpec((tm_eff, r), lambda i, j, k: (i, 0)),       # hoisted x@A^T
                pl.BlockSpec((r, tn_eff), lambda i, j, k: (0, j)),       # scaled B^T slab
            ],
            out_specs=pl.BlockSpec((tm_eff, tn_eff), lambda i, j, k: (i, j)),
            scratch_shapes=[pltpu.VMEM((tm_eff, tn_eff), jnp.float32)],
        ),
        compiler_params=pltpu.CompilerParams(
            dimension_semantics=("parallel", "parallel", "arbitrary"),
            vmem_limit_bytes=vmem_limit,
        ),
    )(x2d, w_t, bias2d, xa, b_scaled_t)

    return out2d[:M, :out_features].reshape(*lead_shape, out_features)


if __name__ == "__main__":
    # Small shapes consistent with the module's forward pass.
    Bz, Lz = 2, 8
    in_features, out_features = 32, 64
    r, alpha = 8, 32
    scaling = alpha / r  # 4.0
    # TODO(synk): the FastSVD / XW-decomposition init in matrix_init has no
    # Pallas equivalent; parameters here are deterministic random stand-ins.

    key = jax.random.PRNGKey(0)
    k_x, k_w, k_b, k_a, k_bb = jax.random.split(key, 5)

    x = jax.random.normal(k_x, (Bz, Lz, in_features), dtype=jnp.float32)
    w_base = jax.random.normal(k_w, (out_features, in_features), dtype=jnp.float32) * 0.05
    bias = jax.random.normal(k_b, (out_features,), dtype=jnp.float32) * 0.05
    dalora_a = jax.random.normal(k_a, (r, in_features), dtype=jnp.float32) * 0.05
    dalora_b = jax.random.normal(k_bb, (out_features, r), dtype=jnp.float32) * 0.05

    out = dalora_linear(x, w_base, bias, dalora_a, dalora_b, scaling)
    out = jax.block_until_ready(out)

    # Pure-JAX reference check (same math as the PyTorch forward).
    ref = (
        jnp.einsum("bli,oi->blo", x, w_base)
        + bias
        + jnp.einsum("blr,or->blo", jnp.einsum("bli,ri->blr", x, dalora_a), dalora_b)
        * scaling
    )
    assert out.shape == (Bz, Lz, out_features)
    assert jnp.allclose(out, ref, atol=1e-4, rtol=1e-4)

    print("KERNEL_OK")
</pallas_src>

<mosaic_0001>
module attributes {stable_mosaic.version = 11 : i64} {
  func.func @_dalora_linear_kernel(%arg0: i32, %arg1: i32, %arg2: i32, %arg3: memref<16x32xf32, #tpu.memory_space<vmem>>, %arg4: memref<32x128xf32, #tpu.memory_space<vmem>>, %arg5: memref<1x128xf32, #tpu.memory_space<vmem>>, %arg6: memref<16x8xf32, #tpu.memory_space<vmem>>, %arg7: memref<8x128xf32, #tpu.memory_space<vmem>>, %arg8: memref<16x128xf32, #tpu.memory_space<vmem>>, %arg9: memref<16x128xf32, #tpu.memory_space<vmem>>) attributes {dimension_semantics = [#tpu.dimension_semantics<parallel>, #tpu.dimension_semantics<parallel>, #tpu.dimension_semantics<arbitrary>], iteration_bounds = array<i64: 1, 1, 1>, scalar_prefetch = 0 : i64, scratch_operands = 1 : i64, tpu.core_type = #tpu.core_type<tc>, window_params = [{transform_indices = @transform_0, window_bounds = array<i64: 16, 32>}, {transform_indices = @transform_1, window_bounds = array<i64: 32, 128>}, {transform_indices = @transform_2, window_bounds = array<i64: 1, 128>}, {transform_indices = @transform_3, window_bounds = array<i64: 16, 8>}, {transform_indices = @transform_4, window_bounds = array<i64: 8, 128>}, {transform_indices = @transform_5, window_bounds = array<i64: 16, 128>}]} {
    %c0_i32 = arith.constant 0 : i32
    %0 = arith.cmpi eq, %arg2, %c0_i32 : i32
    %1 = arith.extui %0 : i1 to i32
    %c0_i32_0 = arith.constant 0 : i32
    %2 = arith.cmpi ne, %1, %c0_i32_0 : i32
    scf.if %2 {
      %cst_10 = arith.constant 0.000000e+00 : f32
      %12 = vector.broadcast %cst_10 : f32 to vector<16x128xf32>
      %c0_11 = arith.constant 0 : index
      %c0_12 = arith.constant 0 : index
      %13 = vector.load %arg9[%c0_11, %c0_12] : memref<16x128xf32, #tpu.memory_space<vmem>>, vector<16x128xf32>
      tpu.vector_store %arg9[%c0_11, %c0_12], %12 {strides = array<i32>} : memref<16x128xf32, #tpu.memory_space<vmem>>, vector<16x128xf32>,
    } else {
    }
    %c0 = arith.constant 0 : index
    %c0_1 = arith.constant 0 : index
    %3 = vector.load %arg9[%c0, %c0_1] : memref<16x128xf32, #tpu.memory_space<vmem>>, vector<16x128xf32>
    %c0_2 = arith.constant 0 : index
    %c0_3 = arith.constant 0 : index
    %4 = vector.load %arg3[%c0_2, %c0_3] : memref<16x32xf32, #tpu.memory_space<vmem>>, vector<16x32xf32>
    %c0_4 = arith.constant 0 : index
    %c0_5 = arith.constant 0 : index
    %5 = vector.load %arg4[%c0_4, %c0_5] : memref<32x128xf32, #tpu.memory_space<vmem>>, vector<32x128xf32>
    %cst = arith.constant dense<0.000000e+00> : vector<16x128xf32>
    %6 = tpu.matmul %4, %5, %cst {dimension_numbers = #tpu.dot_dimension_numbers<[1], [0], [0], [1], [0, 0, 1, 1], [], []>} : vector<16x32xf32>, vector<32x128xf32>, vector<16x128xf32> -> vector<16x128xf32>
    %7 = arith.addf %3, %6 : vector<16x128xf32>
    %c0_6 = arith.constant 0 : index
    %c0_7 = arith.constant 0 : index
    %8 = vector.load %arg9[%c0_6, %c0_7] : memref<16x128xf32, #tpu.memory_space<vmem>>, vector<16x128xf32>
    tpu.vector_store %arg9[%c0_6, %c0_7], %7 {strides = array<i32>} : memref<16x128xf32, #tpu.memory_space<vmem>>, vector<16x128xf32>,
    %c0_i32_8 = arith.constant 0 : i32
    %9 = arith.cmpi eq, %arg2, %c0_i32_8 : i32
    %10 = arith.extui %9 : i1 to i32
    %c0_i32_9 = arith.constant 0 : i32
    %11 = arith.cmpi ne, %10, %c0_i32_9 : i32
    scf.if %11 {
      %c0_10 = arith.constant 0 : index
      %c0_11 = arith.constant 0 : index
      %12 = vector.load %arg6[%c0_10, %c0_11] : memref<16x8xf32, #tpu.memory_space<vmem>>, vector<16x8xf32>
      %c0_12 = arith.constant 0 : index
      %c0_13 = arith.constant 0 : index
      %13 = vector.load %arg7[%c0_12, %c0_13] : memref<8x128xf32, #tpu.memory_space<vmem>>, vector<8x128xf32>
      %cst_14 = arith.constant dense<0.000000e+00> : vector<16x128xf32>
      %14 = tpu.matmul %12, %13, %cst_14 {dimension_numbers = #tpu.dot_dimension_numbers<[1], [0], [0], [1], [0, 0, 1, 1], [], []>} : vector<16x8xf32>, vector<8x128xf32>, vector<16x128xf32> -> vector<16x128xf32>
      %c0_15 = arith.constant 0 : index
      %c0_16 = arith.constant 0 : index
      %15 = vector.load %arg9[%c0_15, %c0_16] : memref<16x128xf32, #tpu.memory_space<vmem>>, vector<16x128xf32>
      %c0_17 = arith.constant 0 : index
      %c0_18 = arith.constant 0 : index
      %16 = vector.load %arg5[%c0_17, %c0_18] : memref<1x128xf32, #tpu.memory_space<vmem>>, vector<1x128xf32>
      %17 = vector.broadcast %16 : vector<1x128xf32> to vector<16x128xf32>
      %18 = arith.addf %15, %17 : vector<16x128xf32>
      %19 = arith.addf %18, %14 : vector<16x128xf32>
      %c0_19 = arith.constant 0 : index
      %c0_20 = arith.constant 0 : index
      %20 = vector.load %arg8[%c0_19, %c0_20] : memref<16x128xf32, #tpu.memory_space<vmem>>, vector<16x128xf32>
      tpu.vector_store %arg8[%c0_19, %c0_20], %19 {strides = array<i32>} : memref<16x128xf32, #tpu.memory_space<vmem>>, vector<16x128xf32>,
    } else {
    }
    return
  }
  func.func @transform_0(%arg0: i32, %arg1: i32, %arg2: i32) -> (i32, i32) {
    %c0_i32 = arith.constant 0 : i32
    return %arg0, %arg2 : i32, i32
  }
  func.func @transform_1(%arg0: i32, %arg1: i32, %arg2: i32) -> (i32, i32) {
    %c0_i32 = arith.constant 0 : i32
    return %arg2, %arg1 : i32, i32
  }
  func.func @transform_2(%arg0: i32, %arg1: i32, %arg2: i32) -> (i32, i32) {
    %c0_i32 = arith.constant 0 : i32
    %c0_i32_0 = arith.constant 0 : i32
    return %c0_i32, %arg1 : i32, i32
  }
  func.func @transform_3(%arg0: i32, %arg1: i32, %arg2: i32) -> (i32, i32) {
    %c0_i32 = arith.constant 0 : i32
    %c0_i32_0 = arith.constant 0 : i32
    return %arg0, %c0_i32 : i32, i32
  }
  func.func @transform_4(%arg0: i32, %arg1: i32, %arg2: i32) -> (i32, i32) {
    %c0_i32 = arith.constant 0 : i32
    %c0_i32_0 = arith.constant 0 : i32
    return %c0_i32, %arg1 : i32, i32
  }
  func.func @transform_5(%arg0: i32, %arg1: i32, %arg2: i32) -> (i32, i32) {
    %c0_i32 = arith.constant 0 : i32
    return %arg0, %arg1 : i32, i32
  }
}

</mosaic_0001>

<bundles_post_ra>
// kernel: tpu_custom_call.1
= control target key start
LH: loop header
LB: loop body
LE: loop exit
PB: predicated region body
PF: predicated region fallthrough
CT: control target
= control target key end

     0   :  { %10 = vsyncpa [#allocation4], 0  ;;  %s433_s0 = inlined_call_operand.vmem [shape: f32[16,32], index: 0, kind: input, shape index: {}]   ;;  %s434_s1 = inlined_call_operand.hbm [shape: f32[32,128], index: 1, kind: input, shape index: {}]   ;;  %s435_s2 = inlined_call_operand.vmem [shape: f32[1,128], index: 2, kind: input, shape index: {}]   ;;  %s436_s3 = inlined_call_operand.vmem [shape: f32[16,8], index: 3, kind: input, shape index: {}]   ;;  %s437_s4 = inlined_call_operand.vmem [shape: f32[8,128], index: 4, kind: input, shape index: {}]   ;;  %s438_s5 = inlined_call_operand.hbm [shape: f32[16,128], index: 5, kind: output, shape index: {}]  }
   0x1   :  { %11 = vsyncpa [#allocation5], 0  ;;  %s349_s18 = smov [#allocation3]   ;;  %s301_s22 = scalar_lea.hbm %s434_s1, 512 }
   0x2   :  { %s19_s19 = sshll.u32 %s349_s18, 4  ;;  %p302_p0 = scmp.ne.s32.totalorder %s434_s1, %s301_s22  ;;  %s20_s19 = int_to_ptr.vmem [resolvable:$true] %s19_s19 }
   0x3   :  { %p305_p1 = scmp.lt.u32.totalorder %s301_s22, %s434_s1 }
   0x5   :  { %p307_p2 = pnand %p305_p1, %p302_p0 }
   0x7   :  { %310 = shalt.err (!%p307_p2)
}
   0x8   :  { %s311_s27 = scalar_lea.vmem %s20_s19, 512  ;;  %p316_p4 = scmp.lt.s32.totalorder %s20_s19, %s20_s19 }
   0x9   :  { %p312_p3 = scmp.ne.s32.totalorder %s20_s19, %s311_s27  ;;  %p317_p5 = scmp.lt.s32.totalorder %s311_s27, %s311_s27 }
   0xb   :  { %p318_p6 = por %p317_p5, %p316_p4 }
   0xd   :  { %p319_p7 = pnand %p318_p6, %p312_p3 }
   0xf   :  { %322 = shalt.err (!%p319_p7)
}
  0x10   :  { %s350_s28 = smov 128   ;;  %s351_s29 = smov 8  }
  0x11   :  { %25 = dma.hbm_to_vmem [thread:$0]  %s434_s1, 512, %s20_s19, [#allocation4], %s350_s28, %s350_s28, %s351_s29  }
  0x12   :  { %345 = dma.done.wait [#allocation4], 512  }
  0x13   :  { %346 = vsyncadd [#allocation4], 4294966784  ;;  %vm141_vm0 = vcmask 64512   ;;  %v45_v0 = vld [vmem:[#allocation3] sm:$0xff]  ;;  %v46_v1 = vld [vmem:[#allocation3 + $0x8] sm:$0xff]  ;;  %vm49_vm1 = vcmask 261120  }
  0x14   :  { %v47_v2 = vld [vmem:[#allocation3 + $0x10] sm:$0xff]  ;;  %v285_v3 = vpack.c.bf16 %v46_v1, %v45_v0  ;;  %v48_v4 = vld [vmem:[#allocation3 + $0x18] sm:$0xff]  ;;  %v140_v5 = vld [vmem:[%s437_s4] sm:$0xff] }
  0x15   :  { %v138_v6 = vld [vmem:[%s436_s3] sm:$0xff]  ;;  %v289_v7 = vpack.c.bf16 %v48_v4, %v47_v2  ;;  %280 = vmatprep.subr.mxu0 %v140_v5  ;;  %v139_v9 = vld [vmem:[%s436_s3 + $0x8] sm:$0xff]  ;;  %s352_s3 = smov [#allocation6]  }
  0x16   :  { %282 = vmatprep.mubr.msk.f32.mxu0 %vm141_vm0, %v138_v6  ;;  %v43_v8 = vld [vmem:[%s433_s0] sm:$0xff]  ;;  %286 = vmatprep.subr.bf16.mxu1 %v285_v3  ;;  %v44_v10 = vld [vmem:[%s433_s0 + $0x8] sm:$0xff]  ;;  %s243_s17 = sshll.u32 %s352_s3, 4  ;;  %s244_s17 = int_to_ptr.vmem [resolvable:$true] %s243_s17 }
  0x17   :  { %281 = vmatpush3.msra.mxu0 %v140_v5  ;;  %288 = vmatpush3.bf16.msra.mxu1 %v285_v3  ;;  %v259_v14 = vld [vmem:[%s435_s2] ss:$0 sm:$0xff]  ;;  %s323_s18 = scalar_lea.vmem %s244_s17, 256  ;;  %p328_p9 = scmp.lt.s32.totalorder %s244_s17, %s244_s17 }
  0x18   :  { %277 = vmatprep.mubr.msk.f32.mxu1 %vm49_vm1, %v43_v8  ;;  %290 = vmatprep.subr.bf16.mxu1 %v289_v7  ;;  %p324_p8 = scmp.ne.s32.totalorder %s244_s17, %s323_s18  ;;  %p329_p10 = scmp.lt.s32.totalorder %s323_s18, %s323_s18 }
  0x19   :  { %283 = vmatmul.mubr.msk.f32.vlgmr.msra.gmra.mrb[0].mxu0 %vm141_vm0, %v139_v9 }
  0x1a   :  { %p330_p11 = por %p329_p10, %p328_p9 }
  0x1b   :  { %292 = vmatpush3.bf16.msra.mxu1 %v289_v7 }
  0x1c   :  { %p331_p12 = pnand %p330_p11, %p324_p8 }
  0x1e   :  { %278 = vmatmul.mubr.msk.f32.vlgmr.msra.gmra.mrb[0].mxu1 %vm49_vm1, %v44_v10 }
  0xec   :  { %v284_v11 = vpop.f32.mrb[0].mxu0 }
  0xed   :  { %v214_v12 = vpop.f32.mrb[1].mxu0 }
  0xf1   :  { %v279_v13 = vpop.f32.mrb[0].mxu1 }
  0xf2   :  { %v293_v15 = vadd.f32 %v284_v11, %v279_v13  ;;  %v122_v16 = vpop.f32.mrb[1].mxu1 }
  0xf3   :  { %v295_v17 = vadd.f32 %v214_v12, %v122_v16 }
  0xf4   :  { %v294_v18 = vadd.f32 %v293_v15, %v259_v14 }
  0xf5   :  { %v296_v19 = vadd.f32 %v295_v17, %v259_v14 }
  0xf6   :  { %237 = vst [vmem:[#allocation6 + $0x8] sm:$0xff] %v294_v18 }
  0xf7   :  { %236 = vst [vmem:[#allocation6] sm:$0xff] %v296_v19 }
  0xf8   :  { %334 = shalt.err (!%p331_p12)
}
  0xf9   :  { %s335_s2 = scalar_lea.hbm %s438_s5, 256 }
  0xfa   :  { %p336_p13 = scmp.ne.s32.totalorder %s438_s5, %s335_s2  ;;  %p339_p0 = scmp.lt.u32.totalorder %s335_s2, %s438_s5 }
  0xfc   :  { %p341_p1 = pnand %p339_p0, %p336_p13 }
  0xfe   :  { %344 = shalt.err (!%p341_p1)
}
  0xff   :  { %249 = dma.vmem_to_hbm [thread:$0]  %s244_s17, 256, %s438_s5, [#allocation5], %s350_s28, %s350_s28, %s351_s29  }
 0x100   :  { %347 = dma.done.wait [#allocation5], 256  }
 0x101   :  { %348 = vsyncadd [#allocation5], 4294967040 }
 0x102   :  { %253 = vsyncpa [#allocation4], 1 }
 0x103   :  { %254 = vsyncpa [#allocation5], 1 }

</bundles_post_ra>
